<compile_context>
chip_gen: v5e
topology: v5e:2x2
jax: 0.10.0
libtpu: 0.0.40
codegen_flags: <defaults>
</compile_context>

<pallas_src>
import jax
import jax.numpy as jnp
from jax.experimental import pallas as pl
from jax.experimental.pallas import tpu as pltpu


# ----------------------------------------------------------------------------
# Unused-in-forward parameters (mirrors Model.__init__ conv stack shapes).
# ----------------------------------------------------------------------------
def make_unused_params():
    k0, k1, k2 = jax.random.split(jax.random.PRNGKey(42), 3)
    return {
        "conv0_w": jax.random.normal(k0, (32, 3, 3, 3), jnp.float32) * 0.02,
        "conv0_b": jnp.zeros((32,), jnp.float32),
        "conv1_w": jax.random.normal(k1, (32, 32, 3, 3), jnp.float32) * 0.02,
        "conv1_b": jnp.zeros((32,), jnp.float32),
        "conv2_w": jax.random.normal(k2, (32, 32, 3, 3), jnp.float32) * 0.02,
        "conv2_b": jnp.zeros((32,), jnp.float32),
    }
    # TODO(synk): self.features / self.pad are dead code in Model.forward, so
    # no Pallas kernels are emitted for them.


# ----------------------------------------------------------------------------
# Pallas kernel: lane-dense whole-slab copy (the fused split([1,1,1,1])+cat).
# ----------------------------------------------------------------------------
def _copy_kernel(x_ref, o_ref):
    o_ref[...] = x_ref[...]


def _sublane_pack(dtype):
    """Rows per fully-packed vreg sublane group: 8 (f32), 16 (bf16), 32 (i8)."""
    itemsize = jnp.dtype(dtype).itemsize
    return max(1, (8 * 4) // itemsize)


def _vmem_budget():
    """(vmem_limit_bytes, per_buffer_tile_bytes) with chip-aware headroom."""
    try:
        cap = pltpu.get_tpu_info().vmem_capacity_bytes
    except Exception:
        cap = 64 << 20  # conservative: v7x per-TC physical VMEM
    # Use at most half of physical VMEM for this call; never request > 64 MiB.
    limit = int(min(cap // 2, 64 << 20))
    # 2 inputs-in-flight + 2 outputs-in-flight (double buffering) + slack.
    per_buffer = limit // 5
    return limit, per_buffer


def _lane_dense_layout(n_elems, dtype):
    """Pick (rows, lanes): rows*lanes == n_elems, lanes % 128 == 0.

    Prefers rows that are a multiple of the dtype sublane pack (fully packed
    vregs), then wider lanes.  Returns None when no lane-dense factorization
    exists (n_elems not a multiple of 128).
    """
    if n_elems % 128 != 0:
        return None
    sub = _sublane_pack(dtype)
    best = None
    lanes = 128
    while lanes <= n_elems:
        if n_elems % lanes == 0:
            rows = n_elems // lanes
            key = (rows % sub == 0, min(lanes, 65536))
            if best is None or key > best[0]:
                best = (key, (rows, lanes))
        lanes *= 2
    return best[1] if best else None


def _pick_tiles(rows, lanes, dtype, per_buffer_bytes):
    """Shrink (tile_r, tile_l) until the per-buffer tile fits the VMEM budget,
    keeping tile_r a multiple of the sublane pack and tile_l a multiple of 128."""
    itemsize = jnp.dtype(dtype).itemsize
    sub = _sublane_pack(dtype)
    tile_r, tile_l = rows, lanes
    while tile_r * tile_l * itemsize > per_buffer_bytes:
        if tile_r % 2 == 0 and (tile_r // 2) % sub == 0:
            tile_r //= 2
        elif tile_l % 2 == 0 and (tile_l // 2) % 128 == 0:
            tile_l //= 2
        else:
            break  # cannot shrink further while staying (sub,128)-aligned
    return tile_r, tile_l


def _maybe_split_for_megacore(rows, lanes, tile_r, tile_l, dtype):
    """Ensure >= 2 grid steps for large tensors so v7x's two TensorCores both
    participate (pure overhead for tiny tensors, so gated on size)."""
    itemsize = jnp.dtype(dtype).itemsize
    total_bytes = rows * lanes * itemsize
    if (rows // tile_r) * (lanes // tile_l) == 1 and total_bytes >= (2 << 20):
        sub = _sublane_pack(dtype)
        if tile_r % 2 == 0 and (tile_r // 2) % sub == 0:
            tile_r //= 2
        elif tile_l % 2 == 0 and (tile_l // 2) % 128 == 0:
            tile_l //= 2
    return tile_r, tile_l


def split_cat_forward(v1):
    """Returns (concatenated_tensor, split_tensors) like Model.forward."""
    B, C, H, W = v1.shape
    assert C == 4, "Model.forward splits dim=1 into [1,1,1,1] -> C must be 4"

    dtype = v1.dtype
    itemsize = jnp.dtype(dtype).itemsize
    n_elems = B * C * H * W

    vmem_limit, per_buffer = _vmem_budget()

    layout = _lane_dense_layout(n_elems, dtype)
    if layout is None:
        # TODO(synk): total element count not a multiple of 128 -> fall back to
        # a single full-block copy (masked stores); fine for small tensors.
        rows, lanes = B * C, H * W
        tile_r, tile_l = rows, lanes
    else:
        rows, lanes = layout
        tile_r, tile_l = _pick_tiles(rows, lanes, dtype, per_buffer)
        tile_r, tile_l = _maybe_split_for_megacore(rows, lanes, tile_r, tile_l, dtype)

    grid = (rows // tile_r, lanes // tile_l)
    x2d = v1.reshape(rows, lanes)

    concatenated2d = pl.pallas_call(
        _copy_kernel,
        out_shape=jax.ShapeDtypeStruct((rows, lanes), dtype),
        grid=grid,
        in_specs=[pl.BlockSpec((tile_r, tile_l), lambda i, j: (i, j))],
        out_specs=pl.BlockSpec((tile_r, tile_l), lambda i, j: (i, j)),
        compiler_params=pltpu.CompilerParams(
            dimension_semantics=("parallel", "parallel"),
            vmem_limit_bytes=vmem_limit,
        ),
        cost_estimate=pl.CostEstimate(
            flops=0, transcendentals=0, bytes_accessed=2 * n_elems * itemsize),
    )(x2d)
    concatenated = concatenated2d.reshape(B, C, H, W)

    # PyTorch returns split *views* of v1; slice v1 directly (under jit these
    # slices fuse with their consumers, adding no extra HBM traffic here).
    split_tensors = tuple(v1[:, i:i + 1, :, :] for i in range(C))
    return concatenated, split_tensors


if __name__ == "__main__":
    _ = make_unused_params()  # deterministic params, unused by forward

    key = jax.random.PRNGKey(0)
    # Small shape consistent with forward: dim=1 must have size 4.
    v1 = jax.random.normal(key, (2, 4, 16, 16), jnp.float32)

    concatenated, splits = split_cat_forward(v1)
    jax.block_until_ready(concatenated)
    jax.block_until_ready(splits)

    # Sanity checks against the reference semantics (cat(split(x)) == x).
    assert concatenated.shape == v1.shape
    assert jnp.array_equal(concatenated, v1)
    for i, s in enumerate(splits):
        assert s.shape == (2, 1, 16, 16)
        assert jnp.array_equal(s, v1[:, i:i + 1, :, :])

    print("KERNEL_OK")
</pallas_src>

<mosaic_0001>
module attributes {stable_mosaic.version = 11 : i64} {
  func.func @_copy_kernel(%arg0: i32, %arg1: i32, %arg2: memref<8x256xf32, #tpu.memory_space<vmem>>, %arg3: memref<8x256xf32, #tpu.memory_space<vmem>>) attributes {dimension_semantics = [#tpu.dimension_semantics<parallel>, #tpu.dimension_semantics<parallel>], iteration_bounds = array<i64: 1, 1>, scalar_prefetch = 0 : i64, scratch_operands = 0 : i64, tpu.core_type = #tpu.core_type<tc>, window_params = [{transform_indices = @transform_0, window_bounds = array<i64: 8, 256>}, {transform_indices = @transform_1, window_bounds = array<i64: 8, 256>}]} {
    %c0 = arith.constant 0 : index
    %c0_0 = arith.constant 0 : index
    %0 = vector.load %arg2[%c0, %c0_0] : memref<8x256xf32, #tpu.memory_space<vmem>>, vector<8x256xf32>
    %c0_1 = arith.constant 0 : index
    %c0_2 = arith.constant 0 : index
    %1 = vector.load %arg3[%c0_1, %c0_2] : memref<8x256xf32, #tpu.memory_space<vmem>>, vector<8x256xf32>
    tpu.vector_store %arg3[%c0_1, %c0_2], %0 {strides = array<i32>} : memref<8x256xf32, #tpu.memory_space<vmem>>, vector<8x256xf32>,
    return
  }
  func.func @transform_0(%arg0: i32, %arg1: i32) -> (i32, i32) {
    %c0_i32 = arith.constant 0 : i32
    return %arg0, %arg1 : i32, i32
  }
  func.func @transform_1(%arg0: i32, %arg1: i32) -> (i32, i32) {
    %c0_i32 = arith.constant 0 : i32
    return %arg0, %arg1 : i32, i32
  }
}

</mosaic_0001>

<bundles_post_ra>
// kernel: tpu_custom_call.1
= control target key start
LH: loop header
LB: loop body
LE: loop exit
PB: predicated region body
PF: predicated region fallthrough
CT: control target
= control target key end

     0   :  { %6 = vsyncpa [#allocation3], 0  ;;  %s116_s0 = inlined_call_operand.hbm [shape: f32[8,256], index: 0, kind: input, shape index: {}]   ;;  %s117_s1 = inlined_call_operand.hbm [shape: f32[8,256], index: 1, kind: output, shape index: {}]  }
   0x1   :  { %7 = vsyncpa [#allocation4], 0  ;;  %s13_s8 = sshll.u32 %s116_s0, 4  ;;  %s98_s9 = smov [#allocation2]   ;;  %s14_s8 = int_to_ptr.hbm [resolvable:$true] %s13_s8 }
   0x2   :  { %s15_s10 = sshll.u32 %s98_s9, 4  ;;  %s16_s10 = int_to_ptr.vmem [resolvable:$true] %s15_s10 }
   0x3   :  { %18 = dma.hbm_to_vmem [thread:$0]  %s14_s8, 256, %s16_s10, [#allocation3]  }
   0x4   :  { %94 = dma.done.wait [#allocation3], 256  }
   0x5   :  { %95 = vsyncadd [#allocation3], 4294967040  ;;  %s99_s11 = smov [#allocation5]   ;;  %s34_s15 = sshll.u32 %s117_s1, 4  ;;  %v23_v0 = vld [vmem:[#allocation2] sm:$0xff]  ;;  %v24_v1 = vld [vmem:[#allocation2 + $0x8] sm:$0xff]  ;;  %s35_s15 = int_to_ptr.hbm [resolvable:$true] %s34_s15 }
   0x6   :  { %s32_s12 = sshll.u32 %s99_s11, 4  ;;  %25 = vst [vmem:[#allocation5] sm:$0xff] %v23_v0  ;;  %s33_s12 = int_to_ptr.vmem [resolvable:$true] %s32_s12 }
   0x7   :  { %26 = vst [vmem:[#allocation5 + $0x8] sm:$0xff] %v24_v1 }
   0x8   :  { %37 = dma.vmem_to_hbm [thread:$0]  %s33_s12, 256, %s35_s15, [#allocation4]  }
   0x9   :  { %96 = dma.done.wait [#allocation4], 256  }
   0xa   :  { %97 = vsyncadd [#allocation4], 4294967040 }
   0xb   :  { %42 = vsyncpa [#allocation3], 1 }
   0xc   :  { %43 = vsyncpa [#allocation4], 1 }

</bundles_post_ra>
